<compile_context>
chip_gen: v7x
topology: tpu7x:2x2x1
jax: 0.10.0
libtpu: 0.0.40
codegen_flags: <defaults>
</compile_context>

<pallas_src>
import math
from functools import partial

import jax
import jax.numpy as jnp
from jax import lax
from jax.experimental import pallas as pl
from jax.experimental.pallas import tpu as pltpu

IN_DIM = 40
HIDDEN = 256

# MXU precision for the two matmuls.  None (lax default, bf16 passes) matches
# the in-script jnp reference and is ~3x cheaper on the MXU (matters on v5e
# where the narrow 40-wide shapes make the MXU the likely bottleneck).  Set
# to jax.lax.Precision.HIGHEST for strict parity with a PyTorch fp32 run.
MATMUL_PRECISION = None


def _cdiv(a, b):
    return -(-a // b)


def _round_up(x, n):
    return ((x + n - 1) // n) * n


def _detect_vmem_bytes():
    """Best-effort VMEM capacity query; conservative (v7x) fallback."""
    try:
        info = pltpu.get_tpu_info()
        v = getattr(info, "vmem_capacity_bytes", None)
        if v:
            return int(v)
    except Exception:
        pass
    return 64 << 20


def _mlp_kernel(x_ref, w1_ref, b1_ref, w2_ref, b2_ref, label_ref,
                out_ref, partial_ref, *, m_total, tile_m):
    # x_ref:   (tile_m, 40)    w1_ref: (40, 256)   b1_ref: (1, 256)
    # w2_ref:  (256, 40)       b2_ref: (1, 40)     label_ref: (tile_m, 40)
    # out_ref: (tile_m, 40)    partial_ref: (1, 8, 128) per-tile loss sum
    x = x_ref[...].astype(jnp.float32)

    # fc1 + relu (MXU matmul, f32 accumulate).
    # TODO(synk): if a v5e bundle shows the vmatmul slot binding, cast the
    # dot operands to bf16 here (keep preferred_element_type=f32).
    h = jnp.dot(x, w1_ref[...], preferred_element_type=jnp.float32,
                precision=MATMUL_PRECISION) + b1_ref[...]
    h = jnp.maximum(h, 0.0)

    # fc2
    y = jnp.dot(h, w2_ref[...], preferred_element_type=jnp.float32,
                precision=MATMUL_PRECISION) + b2_ref[...]
    out_ref[...] = y.astype(out_ref.dtype)

    # Per-tile partial MSE sum.  The last grid block may read uninitialized
    # rows past the true M (no wrapper padding) -> mask them out of the sum.
    # Their output stores are dropped by Pallas automatically.
    diff = y - label_ref[...].astype(jnp.float32)
    sq = diff * diff
    if m_total % tile_m != 0:
        row = (pl.program_id(0) * tile_m
               + lax.broadcasted_iota(jnp.int32, (tile_m, 1), 0))
        sq = jnp.where(row < m_total, sq, 0.0)
    tile_sum = jnp.sum(sq)
    # Lane-dense, unmasked store; wrapper reads [tile, 0, 0].
    partial_ref[...] = jnp.full(partial_ref.shape, tile_sum, dtype=jnp.float32)


def _reference_forward(label, trajectory_prior, params):
    """XLA-fused path (also the fallback for tiny M)."""
    w1, b1, w2, b2 = params
    h = jnp.maximum(
        jnp.dot(trajectory_prior, w1.T, precision=MATMUL_PRECISION) + b1, 0.0)
    y = jnp.dot(h, w2.T, precision=MATMUL_PRECISION) + b2
    return jnp.mean((y - label) ** 2), y


def simple_mlp_forward(label, trajectory_prior, params, *,
                       transition_info=None, maps_info=None,
                       tile_m=None, min_pallas_rows=2048):
    """Returns (loss, prediction), matching SimpleMLP.forward semantics.

    transition_info / maps_info are accepted (and ignored) for signature
    parity with the PyTorch module.
    """
    del transition_info, maps_info
    orig_shape = trajectory_prior.shape
    m = math.prod(orig_shape[:-1])

    # Tiny batches are dominated by pallas_call launch/step cost and defeat
    # the v7x megacore split -> XLA-fused path.
    if m < max(8, min_pallas_rows):
        loss, y = _reference_forward(label, trajectory_prior, params)
        return loss, y

    w1, b1, w2, b2 = params  # torch Linear layout: w1 (256,40), w2 (40,256)
    x2d = trajectory_prior.reshape(m, IN_DIM)
    lbl2d = label.reshape(m, IN_DIM)

    # Per-generation tile / VMEM sizing (working set ~ tile * 4 KiB).
    vmem = _detect_vmem_bytes()
    big_vmem = vmem >= (100 << 20)          # v5e / v6e: 128 MiB
    if tile_m is None:
        tile_m = 16384 if big_vmem else 8192  # v7x (64 MiB) caps at 8192
    vmem_limit = (96 << 20) if big_vmem else (44 << 20)

    # Tile sizing: >= 2 grid steps when possible (v7x uses both TCs via the
    # "parallel" axis), multiple of 8 sublanes, at most one ragged block.
    tile = min(tile_m, _round_up(_cdiv(m, 2), 8))
    tile = max(8, _round_up(tile, 8))
    tile = min(tile, _round_up(m, 8))
    num_tiles = _cdiv(m, tile)

    # Present weights transposed so the kernel does plain x @ W.
    w1_t = jnp.transpose(w1)            # (40, 256)
    w2_t = jnp.transpose(w2)            # (256, 40)
    b1_2d = b1.reshape(1, HIDDEN)
    b2_2d = b2.reshape(1, IN_DIM)

    kernel = partial(_mlp_kernel, m_total=m, tile_m=tile)

    # TODO(synk): on v7x, if profiling shows the masked 40-lane pred store
    # binding (not HBM), widen the pred out block to (tile, 128) and slice
    # [:, :40] in the wrapper.
    pred2d, partials = pl.pallas_call(
        kernel,
        out_shape=(
            jax.ShapeDtypeStruct((m, IN_DIM), trajectory_prior.dtype),
            jax.ShapeDtypeStruct((num_tiles, 8, 128), jnp.float32),
        ),
        grid=(num_tiles,),
        in_specs=[
            pl.BlockSpec((tile, IN_DIM), lambda i: (i, 0)),      # x tile
            pl.BlockSpec((IN_DIM, HIDDEN), lambda i: (0, 0)),    # w1^T (resident)
            pl.BlockSpec((1, HIDDEN), lambda i: (0, 0)),         # b1   (resident)
            pl.BlockSpec((HIDDEN, IN_DIM), lambda i: (0, 0)),    # w2^T (resident)
            pl.BlockSpec((1, IN_DIM), lambda i: (0, 0)),         # b2   (resident)
            pl.BlockSpec((tile, IN_DIM), lambda i: (i, 0)),      # label tile
        ],
        out_specs=(
            pl.BlockSpec((tile, IN_DIM), lambda i: (i, 0)),      # prediction tile
            pl.BlockSpec((1, 8, 128), lambda i: (i, 0, 0)),      # per-tile loss sum
        ),
        compiler_params=pltpu.CompilerParams(
            dimension_semantics=("parallel",),
            vmem_limit_bytes=vmem_limit),
    )(x2d, w1_t, b1_2d, w2_t, b2_2d, lbl2d)

    loss = jnp.sum(partials[:, 0, 0]) * (1.0 / (m * IN_DIM))
    pred = pred2d.reshape(orig_shape)
    return loss, pred


def init_params(key):
    """Deterministic init matching nn.Linear shapes (weight: [out, in])."""
    k1, k2, k3, k4 = jax.random.split(key, 4)
    bound1 = 1.0 / jnp.sqrt(IN_DIM)
    bound2 = 1.0 / jnp.sqrt(HIDDEN)
    w1 = jax.random.uniform(k1, (HIDDEN, IN_DIM), jnp.float32, -bound1, bound1)
    b1 = jax.random.uniform(k2, (HIDDEN,), jnp.float32, -bound1, bound1)
    w2 = jax.random.uniform(k3, (IN_DIM, HIDDEN), jnp.float32, -bound2, bound2)
    b2 = jax.random.uniform(k4, (IN_DIM,), jnp.float32, -bound2, bound2)
    return (w1, b1, w2, b2)


if __name__ == "__main__":
    key = jax.random.PRNGKey(0)
    kp, kd = jax.random.split(key)
    params = init_params(kp)

    # (B, S, tile_m override, min_pallas_rows) -- small shapes, fast to run.
    cases = [
        (2, 8,  None, 0),     # M=16 -> 2 grid steps, no ragged block
        (3, 7,  None, 0),     # M=21 -> ragged last block, masked loss rows
        (2, 24, 16,   0),     # M=48, tile=16 -> 3 tiles, parallel grid
        (1, 4,  None, 2048),  # tiny M -> XLA-fused fallback path
    ]

    for idx, (B, S, tm, thresh) in enumerate(cases):
        k1, k2 = jax.random.split(jax.random.fold_in(kd, idx))
        trajectory_prior = jax.random.normal(k1, (B, S, IN_DIM), jnp.float32)
        label = jax.random.normal(k2, (B, S, IN_DIM), jnp.float32)

        loss, pred = simple_mlp_forward(label, trajectory_prior, params,
                                        tile_m=tm, min_pallas_rows=thresh)
        jax.block_until_ready((loss, pred))

        loss_ref, pred_ref = _reference_forward(label, trajectory_prior, params)
        assert pred.shape == (B, S, IN_DIM)
        assert jnp.allclose(pred, pred_ref, atol=1e-4, rtol=1e-4), (B, S, tm)
        assert jnp.allclose(loss, loss_ref, atol=1e-5, rtol=1e-4), (B, S, tm)

    print("KERNEL_OK")
</pallas_src>

<mosaic_0001>
module attributes {stable_mosaic.version = 11 : i64} {
  func.func @_mlp_kernel(%arg0: i32, %arg1: memref<8x40xf32, #tpu.memory_space<vmem>>, %arg2: memref<40x256xf32, #tpu.memory_space<vmem>>, %arg3: memref<1x256xf32, #tpu.memory_space<vmem>>, %arg4: memref<256x40xf32, #tpu.memory_space<vmem>>, %arg5: memref<1x40xf32, #tpu.memory_space<vmem>>, %arg6: memref<8x40xf32, #tpu.memory_space<vmem>>, %arg7: memref<8x40xf32, #tpu.memory_space<vmem>>, %arg8: memref<1x8x128xf32, #tpu.memory_space<vmem>>) attributes {dimension_semantics = [#tpu.dimension_semantics<parallel>], iteration_bounds = array<i64: 2>, scalar_prefetch = 0 : i64, scratch_operands = 0 : i64, tpu.core_type = #tpu.core_type<tc>, window_params = [{transform_indices = @transform_0, window_bounds = array<i64: 8, 40>}, {pipeline_mode = #tpu.pipeline_mode<synchronous>, transform_indices = @transform_1, window_bounds = array<i64: 40, 256>}, {pipeline_mode = #tpu.pipeline_mode<synchronous>, transform_indices = @transform_2, window_bounds = array<i64: 1, 256>}, {pipeline_mode = #tpu.pipeline_mode<synchronous>, transform_indices = @transform_3, window_bounds = array<i64: 256, 40>}, {pipeline_mode = #tpu.pipeline_mode<synchronous>, transform_indices = @transform_4, window_bounds = array<i64: 1, 40>}, {transform_indices = @transform_5, window_bounds = array<i64: 8, 40>}, {transform_indices = @transform_6, window_bounds = array<i64: 8, 40>}, {transform_indices = @transform_7, window_bounds = array<i64: 1, 8, 128>}]} {
    %c0 = arith.constant 0 : index
    %c0_0 = arith.constant 0 : index
    %0 = vector.load %arg1[%c0, %c0_0] : memref<8x40xf32, #tpu.memory_space<vmem>>, vector<8x40xf32>
    %c0_1 = arith.constant 0 : index
    %c0_2 = arith.constant 0 : index
    %1 = vector.load %arg2[%c0_1, %c0_2] : memref<40x256xf32, #tpu.memory_space<vmem>>, vector<40x256xf32>
    %cst = arith.constant dense<0.000000e+00> : vector<8x256xf32>
    %2 = tpu.matmul %0, %1, %cst {dimension_numbers = #tpu.dot_dimension_numbers<[1], [0], [0], [1], [0, 0, 1, 1], [], []>} : vector<8x40xf32>, vector<40x256xf32>, vector<8x256xf32> -> vector<8x256xf32>
    %c0_3 = arith.constant 0 : index
    %c0_4 = arith.constant 0 : index
    %3 = vector.load %arg3[%c0_3, %c0_4] : memref<1x256xf32, #tpu.memory_space<vmem>>, vector<1x256xf32>
    %4 = vector.broadcast %3 : vector<1x256xf32> to vector<8x256xf32>
    %5 = arith.addf %2, %4 : vector<8x256xf32>
    %cst_5 = arith.constant 0.000000e+00 : f32
    %6 = vector.broadcast %cst_5 : f32 to vector<8x256xf32>
    %7 = arith.maximumf %5, %6 : vector<8x256xf32>
    %c0_6 = arith.constant 0 : index
    %c0_7 = arith.constant 0 : index
    %8 = vector.load %arg4[%c0_6, %c0_7] : memref<256x40xf32, #tpu.memory_space<vmem>>, vector<256x40xf32>
    %cst_8 = arith.constant dense<0.000000e+00> : vector<8x40xf32>
    %9 = tpu.matmul %7, %8, %cst_8 {dimension_numbers = #tpu.dot_dimension_numbers<[1], [0], [0], [1], [0, 0, 1, 1], [], []>} : vector<8x256xf32>, vector<256x40xf32>, vector<8x40xf32> -> vector<8x40xf32>
    %c0_9 = arith.constant 0 : index
    %c0_10 = arith.constant 0 : index
    %10 = vector.load %arg5[%c0_9, %c0_10] : memref<1x40xf32, #tpu.memory_space<vmem>>, vector<1x40xf32>
    %11 = vector.broadcast %10 : vector<1x40xf32> to vector<8x40xf32>
    %12 = arith.addf %9, %11 : vector<8x40xf32>
    %c0_11 = arith.constant 0 : index
    %c0_12 = arith.constant 0 : index
    %13 = vector.load %arg7[%c0_11, %c0_12] : memref<8x40xf32, #tpu.memory_space<vmem>>, vector<8x40xf32>
    tpu.vector_store %arg7[%c0_11, %c0_12], %12 {strides = array<i32>} : memref<8x40xf32, #tpu.memory_space<vmem>>, vector<8x40xf32>,
    %c0_13 = arith.constant 0 : index
    %c0_14 = arith.constant 0 : index
    %14 = vector.load %arg6[%c0_13, %c0_14] : memref<8x40xf32, #tpu.memory_space<vmem>>, vector<8x40xf32>
    %15 = arith.subf %12, %14 : vector<8x40xf32>
    %16 = arith.mulf %15, %15 : vector<8x40xf32>
    %17 = vector.shape_cast %16 : vector<8x40xf32> to vector<1x8x40xf32>
    %cst_15 = arith.constant dense<0.000000e+00> : vector<1xf32>
    %18 = vector.multi_reduction <add>, %17, %cst_15 [1, 2] : vector<1x8x40xf32> to vector<1xf32>
    %19 = vector.shape_cast %18 : vector<1xf32> to vector<1x1x1xf32>
    %20 = vector.extract %19[0, 0, 0] : f32 from vector<1x1x1xf32>
    %21 = vector.broadcast %20 : f32 to vector<1x8x128xf32>
    %c0_16 = arith.constant 0 : index
    %c0_17 = arith.constant 0 : index
    %c0_18 = arith.constant 0 : index
    %22 = vector.load %arg8[%c0_16, %c0_17, %c0_18] : memref<1x8x128xf32, #tpu.memory_space<vmem>>, vector<1x8x128xf32>
    tpu.vector_store %arg8[%c0_16, %c0_17, %c0_18], %21 {strides = array<i32>} : memref<1x8x128xf32, #tpu.memory_space<vmem>>, vector<1x8x128xf32>,
    return
  }
  func.func @transform_0(%arg0: i32) -> (i32, i32) {
    %c0_i32 = arith.constant 0 : i32
    %c0_i32_0 = arith.constant 0 : i32
    return %arg0, %c0_i32 : i32, i32
  }
  func.func @transform_1(%arg0: i32) -> (i32, i32) {
    %c0_i32 = arith.constant 0 : i32
    %c0_i32_0 = arith.constant 0 : i32
    %c0_i32_1 = arith.constant 0 : i32
    return %c0_i32, %c0_i32_0 : i32, i32
  }
  func.func @transform_2(%arg0: i32) -> (i32, i32) {
    %c0_i32 = arith.constant 0 : i32
    %c0_i32_0 = arith.constant 0 : i32
    %c0_i32_1 = arith.constant 0 : i32
    return %c0_i32, %c0_i32_0 : i32, i32
  }
  func.func @transform_3(%arg0: i32) -> (i32, i32) {
    %c0_i32 = arith.constant 0 : i32
    %c0_i32_0 = arith.constant 0 : i32
    %c0_i32_1 = arith.constant 0 : i32
    return %c0_i32, %c0_i32_0 : i32, i32
  }
  func.func @transform_4(%arg0: i32) -> (i32, i32) {
    %c0_i32 = arith.constant 0 : i32
    %c0_i32_0 = arith.constant 0 : i32
    %c0_i32_1 = arith.constant 0 : i32
    return %c0_i32, %c0_i32_0 : i32, i32
  }
  func.func @transform_5(%arg0: i32) -> (i32, i32) {
    %c0_i32 = arith.constant 0 : i32
    %c0_i32_0 = arith.constant 0 : i32
    return %arg0, %c0_i32 : i32, i32
  }
  func.func @transform_6(%arg0: i32) -> (i32, i32) {
    %c0_i32 = arith.constant 0 : i32
    %c0_i32_0 = arith.constant 0 : i32
    return %arg0, %c0_i32 : i32, i32
  }
  func.func @transform_7(%arg0: i32) -> (i32, i32, i32) {
    %c0_i32 = arith.constant 0 : i32
    %c0_i32_0 = arith.constant 0 : i32
    %c0_i32_1 = arith.constant 0 : i32
    return %arg0, %c0_i32, %c0_i32_0 : i32, i32, i32
  }
}

</mosaic_0001>

<bundles_post_ra>
// kernel: tpu_custom_call.1
= control target key start
LH: loop header
LB: loop body
LE: loop exit
PB: predicated region body
PF: predicated region fallthrough
CT: control target
= control target key end

     0   :  { %13 = vsyncpa [#allocation3], 0  ;;  %s1219_s0 = inlined_call_operand.vmem [shape: f32[16,40], index: 0, kind: input, shape index: {}]   ;;  %s1220_s1 = inlined_call_operand.vmem [shape: f32[40,256], index: 1, kind: input, shape index: {}]   ;;  %s1221_s2 = inlined_call_operand.vmem [shape: f32[1,256], index: 2, kind: input, shape index: {}]   ;;  %s1222_s3 = inlined_call_operand.vmem [shape: f32[256,40], index: 3, kind: input, shape index: {}]   ;;  %s1223_s4 = inlined_call_operand.vmem [shape: f32[1,40], index: 4, kind: input, shape index: {}]   ;;  %s1224_s5 = inlined_call_operand.vmem [shape: f32[16,40], index: 5, kind: input, shape index: {}]   ;;  %s1225_s6 = inlined_call_operand.hbm [shape: f32[16,40], index: 6, kind: output, shape index: {0}]   ;;  %s1226_s7 = inlined_call_operand.hbm [shape: f32[2,8,128], index: 7, kind: output, shape index: {1}]  }
   0x1   :  { %15 = vsyncpa [#allocation3 + $0x1], 0 }
   0x2   :  { %16 = vsyncpa [#allocation5], 0 }
   0x3   :  { %18 = vsyncpa [#allocation5 + $0x1], 0  ;;  %s939_s24 = smov 0   ;;  %s941_s25 = smov 0  }
   0x4   :  { %s943_s26 = smov 0   ;;  %s945_s27 = smov 0  }
   0x5 LB: > { %s960_s28 = sadd.s32 4294967295, %s894_s27   ;;  %s662_s29 = sadd.s32 4294967294, %s894_s27   ;;  %s894_s27 = sphi %s945_s27, %s1232_s27   ;;  %s890_s26 = sphi %s943_s26, %s1231_s26   ;;  %s886_s25 = sphi %s941_s25, %s1230_s25   ;;  %s882_s24 = sphi %s939_s24, %s1229_s24  }
   0x6   : > { %s964_s30 = sadd.s32 1, %s894_s27   ;;  %s167_s8 = sadd.s32 1, %s890_s26 }
   0x7   : > { %s164_s9 = ssub.s32 %s894_s27, %s964_s30  ;;  %p177_p0 = scmp.ne.s32.totalorder %s890_s26, %s886_s25 }
   0x8   : > { %p165_p1 = scmp.eq.s32.totalorder %s164_s9, 0  ;;  %p178_p2 = scmp.eq.s32.totalorder %s960_s28, 1 }
   0x9   : > { %p183_p3 = scmp.ne.s32.totalorder %s886_s25, %s882_s24  ;;  %p184_p4 = scmp.eq.s32.totalorder %s662_s29, 1 }
   0xa   : > { %s975_s10 = scalar_select %p165_p1, %s890_s26, %s167_s8  }
   0xb   : > { %p977_p5 = por %p178_p2, %p177_p0  ;;  %p981_p6 = por %p184_p4, %p183_p3 }
   0xc   : > { %p665_p7 = scmp.ge.s32.totalorder %s894_s27, 1  ;;  %p254_p8 = scmp.lt.s32.totalorder %s894_s27, 3 }
   0xe   : > { %p255_p9 = pnand %p665_p7, %p254_p8 }
   0xf   : > { %v304_v0 = vld [vmem:[%s1220_s1 + $0x8] sm:$0xff] (!%p255_p9)  ;;  %v306_v1 = vld [vmem:[%s1220_s1 + $0x18] sm:$0xff] (!%p255_p9)  ;;  %v303_v2 = vld [vmem:[%s1220_s1] sm:$0xff] (!%p255_p9)  ;;  %p294_p10 = scmp.lt.s32.totalorder (!%p255_p9), %s960_s28, 1  ;;  %v896_v7 = vmov (!%p255_p9), 0.0   ;;  %vm325_vm0 = vcmask (!%p255_p9), 326656  }
  0x10   : > { %258 = sbr.rel (%p255_p9) target bundleno = 687 (0x2af), region = 44  ;;  %v713_v3 = vpack.c.bf16 (!%p255_p9), %v306_v1, %v304_v0  ;;  %v305_v4 = vld [vmem:[%s1220_s1 + $0x10] sm:$0xff] (!%p255_p9)  ;;  %v308_v5 = vld [vmem:[%s1220_s1 + $0x28] sm:$0xff] (!%p255_p9)  ;;  %v310_v6 = vld [vmem:[%s1220_s1 + $0x38] sm:$0xff] (!%p255_p9)  ;;  %393 = vmatprep.mubr.f32.mxu0 (!%p255_p9), %v896_v7  ;;  %v315_v0 = vlaneseq (!%p255_p9)  ;;  %s1128_s18 = sand.u32 (!%p255_p9), 1, %s886_s25  }
  0x11   : > { %v715_v8 = vpack.c.bf16 (!%p255_p9), %v305_v4, %v303_v2  ;;  %v717_v9 = vpack.c.bf16 (!%p255_p9), %v310_v6, %v308_v5  ;;  %v307_v10 = vld [vmem:[%s1220_s1 + $0x20] sm:$0xff] (!%p255_p9)  ;;  %v309_v11 = vld [vmem:[%s1220_s1 + $0x30] sm:$0xff] (!%p255_p9)  ;;  %v419_v13 = vld [vmem:[%s1222_s3 + $0x88] sm:$0xff] (!%p255_p9)  ;;  %s528_s17 = scalar_lea.sflag (!%p255_p9), [#allocation3], %s1128_s18  ;;  %s897_s21 = smov (!%p255_p9), [#allocation2]  }
  0x12   : > { %714 = vmatprep.subr.bf16.mxu0 (!%p255_p9), %v713_v3  ;;  %v418_v12 = vld [vmem:[%s1222_s3 + $0x80] sm:$0xff] (!%p255_p9)  ;;  %v719_v14 = vpack.c.bf16 (!%p255_p9), %v309_v11, %v307_v10  ;;  %v403_v17 = vld [vmem:[%s1222_s3 + $0x8] sm:$0xff] (!%p255_p9)  ;;  %v420_v18 = vld [vmem:[%s1222_s3 + $0x90] sm:$0xff] (!%p255_p9)  ;;  %v316_v1 = vshrl.u32 (!%p255_p9), %v315_v0, 7 }
  0x13   : > { %716 = vmatpush1.bf16.msra.mxu0 (!%p255_p9), %v715_v8  ;;  %v721_v15 = vpack.c.bf16 (!%p255_p9), %v419_v13, %v418_v12  ;;  %v402_v16 = vld [vmem:[%s1222_s3] sm:$0xff] (!%p255_p9)  ;;  %v421_v20 = vld [vmem:[%s1222_s3 + $0x98] sm:$0xff] (!%p255_p9)  ;;  %v404_v21 = vld [vmem:[%s1222_s3 + $0x10] sm:$0xff] (!%p255_p9) }
  0x14   : > { %718 = vmatprep.subr.bf16.mxu0 (!%p255_p9), %v717_v9  ;;  %v723_v19 = vpack.c.bf16 (!%p255_p9), %v403_v17, %v402_v16  ;;  %v405_v22 = vld [vmem:[%s1222_s3 + $0x18] sm:$0xff] (!%p255_p9)  ;;  %v312_v23 = vld [vmem:[%s1220_s1 + $0x48] sm:$0xff] (!%p255_p9)  ;;  %v725_v24 = vpack.c.bf16 (!%p255_p9), %v421_v20, %v420_v18  ;;  %v422_v25 = vld [vmem:[%s1222_s3 + $0xa0] sm:$0xff] (!%p255_p9)  ;;  %v317_v2 = vsub.s32 (!%p255_p9), 0, %v316_v1  ;;  %v321_v4 = vsub.s32 (!%p255_p9), 1, %v316_v1 }
  0x15   : > { %722 = vmatprep.subr.bf16.mxu1 (!%p255_p9), %v721_v15  ;;  %v423_v26 = vld [vmem:[%s1222_s3 + $0xa8] sm:$0xff] (!%p255_p9)  ;;  %v727_v27 = vpack.c.bf16 (!%p255_p9), %v405_v22, %v404_v21  ;;  %v406_v29 = vld [vmem:[%s1222_s3 + $0x20] sm:$0xff] (!%p255_p9)  ;;  %v424_v32 = vld [vmem:[%s1222_s3 + $0xb0] sm:$0xff] (!%p255_p9) }
  0x16   : > { %724 = vmatpush3.bf16.msra.mxu1 (!%p255_p9), %v723_v19  ;;  %v729_v28 = vpack.c.bf16 (!%p255_p9), %v423_v26, %v422_v25  ;;  %v407_v30 = vld [vmem:[%s1222_s3 + $0x28] sm:$0xff] (!%p255_p9)  ;;  %v311_v31 = vld [vmem:[%s1220_s1 + $0x40] sm:$0xff] (!%p255_p9)  ;;  %v425_v33 = vld [vmem:[%s1222_s3 + $0xb8] sm:$0xff] (!%p255_p9) }
  0x17   : > { %s1013_s15 = scalar_select %p294_p10, %s960_s28, 1  ;;  %720 = vmatpush1.bf16.msra.mxu0 %v719_v14  ;;  %726 = vmatprep.subr.bf16.mxu1 %v725_v24  ;;  %v731_v35 = vpack.c.bf16 %v407_v30, %v406_v29  ;;  %v733_v36 = vpack.c.bf16 %v425_v33, %v424_v32  ;;  %v408_v37 = vld [vmem:[%s1222_s3 + $0x30] sm:$0xff]  ;;  %v409_v38 = vld [vmem:[%s1222_s3 + $0x38] sm:$0xff]  ;;  %v426_v39 = vld [vmem:[%s1222_s3 + $0xc0] sm:$0xff] }
  0x18   : > { %337 = vmatprep.subr.mxu0 %v312_v23  ;;  %v427_v40 = vld [vmem:[%s1222_s3 + $0xc8] sm:$0xff]  ;;  %v735_v41 = vpack.c.bf16 %v409_v38, %v408_v37  ;;  %v410_v43 = vld [vmem:[%s1222_s3 + $0x40] sm:$0xff]  ;;  %v428_v45 = vld [vmem:[%s1222_s3 + $0xd0] sm:$0xff] }
  0x19   : > { %s668_s20 = sshll.u32 %s1013_s15, 3  ;;  %v737_v42 = vpack.c.bf16 %v427_v40, %v426_v39  ;;  %v411_v44 = vld [vmem:[%s1222_s3 + $0x48] sm:$0xff]  ;;  %v429_v46 = vld [vmem:[%s1222_s3 + $0xd8] sm:$0xff]  ;;  %v412_v49 = vld [vmem:[%s1222_s3 + $0x50] sm:$0xff]  ;;  %s674_s15 = sshll.u32 %s960_s28, 7 }
  0x1a   : > { %s297_s16 = scalar_lea.vmem %s1219_s0, %s668_s20  ;;  %728 = vmatpush3.bf16.msra.mxu1 %v727_v27  ;;  %v739_v47 = vpack.c.bf16 %v411_v44, %v410_v43  ;;  %v741_v48 = vpack.c.bf16 %v429_v46, %v428_v45  ;;  %v413_v50 = vld [vmem:[%s1222_s3 + $0x58] sm:$0xff]  ;;  %v430_v51 = vld [vmem:[%s1222_s3 + $0xe0] sm:$0xff]  ;;  %v431_v52 = vld [vmem:[%s1222_s3 + $0xe8] sm:$0xff]  ;;  %s301_s22 = scalar_lea.vmem %s1224_s5, %s668_s20 }
  0x1b   : > { %v302_v34 = vld [vmem:[%s297_s16] sm:$0xff]  ;;  %338 = vmatpush1.msra.mxu0 %v311_v31  ;;  %730 = vmatprep.subr.bf16.mxu1 %v729_v28  ;;  %v743_v53 = vpack.c.bf16 %v413_v50, %v412_v49  ;;  %v745_v54 = vpack.c.bf16 %v431_v52, %v430_v51  ;;  %v415_v56 = vld [vmem:[%s1222_s3 + $0x68] sm:$0xff]  ;;  %v432_v58 = vld [vmem:[%s1222_s3 + $0xf0] sm:$0xff]  ;;  %s666_s16 = sshll.u32 %s1128_s18, 3  ;;  %s1149_s13 = scalar_lea.hbm %s1225_s6, %s674_s15 }
  0x1c   : > { %670 = vmatmul.mubr.msk.f32.vlgmr.msra.gmra.mrb[0].mxu0 %vm325_vm0, %v302_v34  ;;  %v414_v55 = vld [vmem:[%s1222_s3 + $0x60] sm:$0xff]  ;;  %v433_v59 = vld [vmem:[%s1222_s3 + $0xf8] sm:$0xff]  ;;  %v416_v61 = vld [vmem:[%s1222_s3 + $0x70] sm:$0xff]  ;;  %s286_s8 = scalar_lea.vmem [#allocation2], %s666_s16 }
  0x1d   : > { %v747_v57 = vpack.c.bf16 %v415_v56, %v414_v55  ;;  %v749_v60 = vpack.c.bf16 %v433_v59, %v432_v58  ;;  %v417_v62 = vld [vmem:[%s1222_s3 + $0x78] sm:$0xff]  ;;  %v313_v3 = vld [vmem:[%s1221_s2] sm:$0x3]  ;;  %s546_s14 = sshll.u32 %s286_s8, 4  ;;  %s547_s14 = int_to_ptr.vmem [resolvable:$true] %s546_s14 }
  0x1e   : > { %732 = vmatpush3.bf16.msra.mxu1 %v731_v35  ;;  %v751_v63 = vpack.c.bf16 %v417_v62, %v416_v61  ;;  %v318_v5 = vrot.slane %v313_v3, %v317_v2  ;;  %v322_v6 = vrot.slane %v313_v3, %v321_v4  ;;  %v671_v14 = vld [vmem:[%s1223_s4] ss:$0 sm:$0xff]  ;;  %s800_s19 = scalar_lea.vmem %s547_s14, 128 }
  0x1f   : > { %734 = vmatprep.subr.bf16.mxu1 %v733_v36  ;;  %v512_v17 = vld [vmem:[%s301_s22] sm:$0xff]  ;;  %p801_p11 = scmp.ne.s32.totalorder %s547_s14, %s800_s19  ;;  %s804_s22 = sshll.u32 %s897_s21, 4  ;;  %s805_s22 = int_to_ptr.vmem [resolvable:$false] %s804_s22 }
  0x20   : > { %s806_s23 = scalar_lea.vmem %s805_s22, 256  ;;  %p807_p0 = scmp.lt.s32.totalorder %s547_s14, %s805_s22 }
  0x21   : > { %p802_p12 = pnand %p801_p11, %p977_p5  ;;  %p808_p1 = scmp.lt.s32.totalorder %s806_s23, %s800_s19 }
  0x22   : > { %736 = vmatpush3.bf16.msra.mxu1 %v735_v41 }
  0x23   : > { %738 = vmatprep.subr.bf16.mxu1 %v737_v42  ;;  %p803_p13 = pneg %p802_p12  ;;  %p809_p2 = por %p808_p1, %p807_p0 }
  0x25   : > { %p810_p3 = pnand %p809_p2, %p803_p13 }
  0x26   : > { %740 = vmatpush3.bf16.msra.mxu1 %v739_v47 }
  0x27   : > { %742 = vmatprep.subr.bf16.mxu1 %v741_v48 }
  0x2a   : > { %744 = vmatpush3.bf16.msra.mxu1 %v743_v53 }
  0x2b   : > { %746 = vmatprep.subr.bf16.mxu1 %v745_v54 }
  0x2e   : > { %748 = vmatpush3.bf16.msra.mxu1 %v747_v57 }
  0x2f   : > { %750 = vmatprep.subr.bf16.mxu1 %v749_v60 }
  0x32   : > { %752 = vmatpush3.bf16.msra.mxu1 %v751_v63 }
  0xef   : > { %v395_v7 = vpop.f32.mrb[0].mxu0 }
  0xf0   : > { %v396_v8 = vadd.f32 %v395_v7, %v318_v5  ;;  %v397_v9 = vpop.f32.mrb[1].mxu0 }
  0xf1   : > { %v398_v10 = vadd.f32 %v397_v9, %v322_v6 }
  0xf2   : > { %v400_v12 = vmax.f32 %v396_v8, 0.0 }
  0xf3   : > { %v401_v11 = vmax.f32 %v398_v10, 0.0 }
  0xf5   : > { %505 = vmatprep.mubr.f32.mxu1 %v401_v11 }
  0xf6   : > { %506 = vmatmul.mubr.f32.vlgmr.msra.gmra.mrb[0].mxu1 %v400_v12 }
 0x1c9   : > { %v710_v13 = vpop.f32.mrb[0].mxu1 }
 0x1ca   : > { %v711_v15 = vpop.f32.mrb[1].mxu1 }
 0x1cb   : > { %v712_v16 = vadd.f32 %v711_v15, %v710_v13 }
 0x1cd   : > { %v508_v18 = vadd.f32 %v712_v16, %v671_v14 }
 0x1cf   : > { %v513_v19 = vsub.f32 %v508_v18, %v512_v17  ;;  %511 = vst.msk [vmem:[%s286_s8] sm:$0xff] %vm325_vm0, %v508_v18 }
 0x1d1   : > { %v514_v20 = vmul.f32 %v513_v19, %v513_v19 }
 0x1d3   : > { %v515_v21 = vsel %vm325_vm0, %v514_v20, 0.0 }
 0x1d4   : > { %516 = vadd.xlane.f32.xlu0 %v515_v21 }
 0x1d5   : > { %813 = shalt.err (!%p810_p3)
}
 0x1d6   : > { %s814_s29 = scalar_lea.hbm %s1149_s13, 128  ;;  %s818_s9 = scalar_lea.hbm %s1225_s6, 256 }
 0x1d7   : > { %p815_p4 = scmp.ne.s32.totalorder %s1149_s13, %s814_s29  ;;  %p819_p9 = scmp.lt.u32.totalorder %s1149_s13, %s1225_s6 }
 0x1d8   : > { %p820_p10 = scmp.lt.u32.totalorder %s818_s9, %s814_s29  ;;  %p822_p12 = scmp.lt.u32.totalorder %s814_s29, %s1149_s13 }
 0x1d9   : > { %p816_p7 = pnand %p815_p4, %p977_p5 }
 0x1da   : > { %p821_p11 = por %p820_p10, %p819_p9 }
 0x1db   : > { %p817_p8 = pneg %p816_p7 }
 0x1dc   : > { %p823_p13 = por %p822_p12, %p821_p11 }
 0x1de   : > { %p824_p0 = pnand %p823_p13, %p817_p8 }
 0x1e0   : > { %827 = shalt.err (!%p824_p0)
}
 0x1e1   : > { %755 = dma.vmem_to_hbm [thread:$0]  (%p977_p5), %s547_s14, 128, %s1149_s13, %s528_s17  }
 0x1e2   : > { %s293_s19 = scalar_lea.vmem [#allocation4], %s666_s16  ;;  %s1178_s17 = scalar_lea.hbm %s1226_s7, %s674_s15 }
 0x1e3   : > { %s559_s23 = sshll.u32 %s293_s19, 4  ;;  %s533_s8 = scalar_lea.sflag [#allocation5], %s1128_s18  ;;  %s1171_s23 = int_to_ptr.vmem [resolvable:$true] %s559_s23 }
 0x1e4   : > { %s828_s20 = scalar_lea.vmem %s1171_s23, 128  ;;  %s898_s16 = smov [#allocation4]  }
 0x1e5   : > { %p829_p1 = scmp.ne.s32.totalorder %s1171_s23, %s828_s20  ;;  %s832_s9 = sshll.u32 %s898_s16, 4  ;;  %s833_s9 = int_to_ptr.vmem [resolvable:$false] %s832_s9 }
 0x1e6   : > { %s834_s21 = scalar_lea.vmem %s833_s9, 256  ;;  %p835_p4 = scmp.lt.s32.totalorder %s1171_s23, %s833_s9 }
 0x1e7   : > { %p830_p2 = pnand %p829_p1, %p977_p5  ;;  %p836_p7 = scmp.lt.s32.totalorder %s834_s21, %s828_s20 }
 0x1e9   : > { %p831_p3 = pneg %p830_p2  ;;  %p837_p8 = por %p836_p7, %p835_p4 }
 0x1eb   : > { %p838_p9 = pnand %p837_p8, %p831_p3 }
 0x261   : > { %v517_v22 = vpop.xlane.xlu0 %516 }
 0x262   : > { %v518_v23 = vrot.slane %v517_v22, 4 }
 0x264   : > { %v519_v24 = vadd.f32 %v518_v23, %v517_v22 }
 0x266   : > { %v520_v25 = vrot.slane %v519_v24, 2 }
 0x268   : > { %v521_v26 = vadd.f32 %v520_v25, %v519_v24 }
 0x26a   : > { %v522_v27 = vrot.slane %v521_v26, 1 }
 0x26c   : > { %v523_v28 = vadd.f32 %v522_v27, %v521_v26 }
 0x26e   : > { %753 = vpush %v523_v28 }
 0x29f   : > { %s754_s29 = spop %753 }
 0x2a0   : > { %v525_v29 = vstv %s754_s29 }
 0x2a1   : > { %526 = vst [vmem:[%s293_s19] sm:$0xff] %v525_v29 }
 0x2a2   : > { %841 = shalt.err (!%p838_p9)
}
 0x2a3   : > { %s842_s28 = scalar_lea.hbm %s1178_s17, 128  ;;  %s846_s22 = scalar_lea.hbm %s1226_s7, 256 }
 0x2a4   : > { %p843_p10 = scmp.ne.s32.totalorder %s1178_s17, %s842_s28  ;;  %p847_p13 = scmp.lt.u32.totalorder %s1178_s17, %s1226_s7 }
 0x2a5   : > { %p848_p0 = scmp.lt.u32.totalorder %s846_s22, %s842_s28  ;;  %p850_p2 = scmp.lt.u32.totalorder %s842_s28, %s1178_s17 }
 0x2a6   : > { %p844_p11 = pnand %p843_p10, %p977_p5 }
 0x2a7   : > { %p849_p1 = por %p848_p0, %p847_p13 }
 0x2a8   : > { %p845_p12 = pneg %p844_p11 }
 0x2a9   : > { %p851_p3 = por %p850_p2, %p849_p1 }
 0x2ab   : > { %p852_p4 = pnand %p851_p3, %p845_p12 }
 0x2ad   : > { %855 = shalt.err (!%p852_p4)
}
 0x2ae   : > { %756 = dma.vmem_to_hbm [thread:$0]  (%p977_p5), %s1171_s23, 128, %s1178_s17, %s533_s8  }
 0x2af PF: > { %p766_p7 = scmp.ge.s32.totalorder %s894_s27, 2  ;;  %s571_s13 = sand.u32 1, %s882_s24  }
 0x2b0   : > { %s572_s14 = scalar_lea.sflag [#allocation3], %s571_s13 }
 0x2b1   : > { %p760_p8 = pnand %p766_p7, %p981_p6 }
 0x2b3   : > { %873 = dma.done.wait (!%p760_p8), %s572_s14, 128  }
 0x2b4   : > { %875 = vsyncadd (!%p760_p8), %s572_s14, 4294967168  ;;  %s581_s20 = scalar_lea.sflag [#allocation5], %s571_s13 }
 0x2b5   : > { %877 = dma.done.wait (!%p760_p8), %s581_s20, 128  }
 0x2b6   : > { %879 = vsyncadd (!%p760_p8), %s581_s20, 4294967168  ;;  %p21_p5 = scmp.ge.s32.totalorder %s964_s30, 4   ;;  %s1229_s24 = smov %s886_s25 }
 0x2b7   : > { %s1230_s25 = smov %s890_s26  ;;  %s1231_s26 = smov %s975_s10 }
 0x2b8   : > { %s1232_s27 = smov %s964_s30  ;;  %23 = sbr.rel (!%p21_p5) target bundleno = 5 (0x5), region = 99 }
 0x2bf   :  { %586 = vsyncpa [#allocation3], 1 }
 0x2c0   :  { %588 = vsyncpa [#allocation3 + $0x1], 1 }
 0x2c1   :  { %589 = vsyncpa [#allocation5], 1 }
 0x2c2   :  { %591 = vsyncpa [#allocation5 + $0x1], 1 }

</bundles_post_ra>
